<compile_context>
chip_gen: v5e
topology: v5e:2x2
jax: 0.10.0
libtpu: 0.0.40
codegen_flags: <defaults>
</compile_context>

<pallas_src>
import functools

import jax
import jax.numpy as jnp
import numpy as np
from jax.experimental import pallas as pl
from jax.experimental.pallas import tpu as pltpu

L_OUT = 336  # fixed by the module: nn.AdaptiveAvgPool1d(336)


def _round_up(x: int, m: int) -> int:
    return ((x + m - 1) // m) * m


def _vmem_capacity_bytes() -> int:
    try:
        return int(pltpu.get_tpu_info().vmem_capacity_bytes)
    except Exception:
        return 64 * 1024 * 1024  # conservative default (v7x per-TC VMEM)


@functools.lru_cache(maxsize=None)
def _pool_mask_and_inv(l_in: int, l_out: int, mask_dtype: str):
    """0/1 membership matrix (l_in, l_out) in `mask_dtype` (exact even in bf16)
    and f32 (1, l_out) row of 1/bin_count, with nn.AdaptiveAvgPool1d semantics."""
    i = np.arange(l_out)
    starts = (i * l_in) // l_out                      # floor(i * L / Lo)
    ends = ((i + 1) * l_in + l_out - 1) // l_out      # ceil((i+1) * L / Lo)
    j = np.arange(l_in)[:, None]
    mask = ((j >= starts[None, :]) & (j < ends[None, :])).astype(np.float32)
    inv = (1.0 / (ends - starts).astype(np.float32))[None, :]
    return (jnp.asarray(mask, dtype=jnp.dtype(mask_dtype)),
            jnp.asarray(inv, dtype=jnp.float32))


def _resident_spec(block_shape):
    """BlockSpec whose block index never changes: single-buffer when supported."""
    index_map = lambda i: (0, 0)
    try:
        return pl.BlockSpec(block_shape, index_map, pipeline_mode=pl.Buffered(1))
    except (AttributeError, TypeError):  # older jax without pipeline_mode/Buffered
        return pl.BlockSpec(block_shape, index_map)


def _choose_tm(m: int, l_in: int, l_out: int,
               x_itemsize: int, mask_itemsize: int, out_itemsize: int) -> int:
    """Row-tile size: big enough to amortize per-step overhead, small enough that
    (single-buffered mask + double-buffered x/out tiles) fit the chip's VMEM."""
    cap = _vmem_capacity_bytes()
    usable = int(cap * 0.75)                                    # compiler-scratch headroom
    resident = l_in * l_out * mask_itemsize + 8 * l_out * 4     # mask + inv row
    per_row = 2 * (l_in * x_itemsize + l_out * out_itemsize)    # double-buffered x + out
    budget = max(usable - resident, 8 * per_row)
    tm = 512       # ~1 MB tiles already saturate pipelined-DMA efficiency; no need larger
    while tm > 8 and tm * per_row > budget:
        tm //= 2
    if m <= tm:
        if m >= 256:
            tm = _round_up((m + 1) // 2, 8)   # >=2 row tiles -> both v7x TensorCores busy
        else:
            tm = m                            # single full-extent block (legal for any m)
    return tm


def _pool_kernel(x_ref, mask_ref, inv_ref, o_ref):
    # (TM, L_in) @ (L_in, 336) on the MXU, f32 accumulation; 1/count applied in f32.
    acc = jnp.dot(x_ref[...], mask_ref[...], preferred_element_type=jnp.float32)
    o_ref[...] = (acc * inv_ref[...]).astype(o_ref.dtype)


@functools.partial(jax.jit, static_argnames=("l_out", "use_bf16_matmul", "tm"))
def adaptive_avg_pool1d(x: jnp.ndarray, l_out: int = L_OUT, *,
                        use_bf16_matmul: bool = False, tm: int | None = None) -> jnp.ndarray:
    """x: (B, C, L_in) -> (B, C, l_out), matching nn.AdaptiveAvgPool1d(l_out)."""
    b, c, l_in = x.shape
    m = b * c
    out_dtype = x.dtype
    compute_dtype = jnp.bfloat16 if use_bf16_matmul else jnp.float32

    mask, inv = _pool_mask_and_inv(l_in, l_out, jnp.dtype(compute_dtype).name)

    x2d = x.reshape(m, l_in)
    if use_bf16_matmul:
        # Only a win when the MXU is the bound unit (v5e; v6e at long L_in) or
        # when the producer already emits bf16 (cast here is an extra pass).
        x2d = x2d.astype(jnp.bfloat16)

    x_itemsize = jnp.dtype(compute_dtype).itemsize
    out_itemsize = jnp.dtype(out_dtype).itemsize
    if tm is None:
        tm = _choose_tm(m, l_in, l_out, x_itemsize, x_itemsize, out_itemsize)
    tm = min(tm, m)  # explicit tm override must be a multiple of 8 or >= m
    grid = (pl.cdiv(m, tm),)  # ragged final block: padded on read, masked on write

    cap = _vmem_capacity_bytes()
    need = (l_in * l_out * x_itemsize          # resident mask (single-buffered)
            + 2 * l_out * 4                    # inv row
            + 2 * tm * l_in * x_itemsize       # double-buffered x tiles
            + 2 * tm * l_out * out_itemsize)   # double-buffered out tiles
    vmem_limit = int(min(cap * 0.85, max(need * 1.5, 16 * 1024 * 1024)))

    cost = pl.CostEstimate(
        flops=2 * m * l_in * l_out,
        transcendentals=0,
        bytes_accessed=(m * l_in * x_itemsize + l_in * l_out * x_itemsize
                        + l_out * 4 + m * l_out * out_itemsize),
    )

    out2d = pl.pallas_call(
        _pool_kernel,
        out_shape=jax.ShapeDtypeStruct((m, l_out), out_dtype),
        grid_spec=pltpu.PrefetchScalarGridSpec(
            num_scalar_prefetch=0,
            grid=grid,
            in_specs=[
                pl.BlockSpec((tm, l_in), lambda i: (i, 0)),  # row tiles of x
                _resident_spec((l_in, l_out)),               # 0/1 mask, DMA'd once
                _resident_spec((1, l_out)),                  # f32 1/count row, DMA'd once
            ],
            out_specs=pl.BlockSpec((tm, l_out), lambda i: (i, 0)),
        ),
        compiler_params=pltpu.CompilerParams(
            dimension_semantics=("parallel",),   # rows independent -> megacore-shardable
            vmem_limit_bytes=vmem_limit,
        ),
        cost_estimate=cost,
    )(x2d, mask, inv)

    return out2d.reshape(b, c, l_out)


def _reference_np(x_np: np.ndarray, l_out: int = L_OUT) -> np.ndarray:
    """Exact host-side reference matching torch.nn.AdaptiveAvgPool1d semantics."""
    l_in = x_np.shape[-1]
    i = np.arange(l_out)
    starts = (i * l_in) // l_out
    ends = ((i + 1) * l_in + l_out - 1) // l_out
    cols = [x_np[..., s:e].mean(axis=-1) for s, e in zip(starts, ends)]
    return np.stack(cols, axis=-1).astype(x_np.dtype)


if __name__ == "__main__":
    key = jax.random.PRNGKey(0)

    # Primary small test: (batch, channels, length) consistent with the module's NCL input.
    B, C, L_IN = 2, 4, 512
    x = jax.random.normal(key, (B, C, L_IN), dtype=jnp.float32)
    out = jax.block_until_ready(adaptive_avg_pool1d(x))
    ref = _reference_np(np.asarray(x))
    assert out.shape == (B, C, L_OUT), out.shape
    assert np.allclose(np.asarray(out), ref, atol=1e-4, rtol=1e-4)

    # Ragged row tiling (m=15, tm=8 -> 2 grid steps, masked final block) + odd L_in.
    key2 = jax.random.PRNGKey(1)
    B2, C2, L_IN2 = 3, 5, 448
    x2 = jax.random.normal(key2, (B2, C2, L_IN2), dtype=jnp.float32)
    out2 = jax.block_until_ready(adaptive_avg_pool1d(x2, tm=8))
    ref2 = _reference_np(np.asarray(x2))
    assert out2.shape == (B2, C2, L_OUT), out2.shape
    assert np.allclose(np.asarray(out2), ref2, atol=1e-4, rtol=1e-4)

    # Optional bf16-MXU path (for MXU-bound cases): exact 0/1 bf16 mask, f32 1/count scale.
    out_bf16 = jax.block_until_ready(adaptive_avg_pool1d(x, use_bf16_matmul=True))
    assert out_bf16.shape == (B, C, L_OUT), out_bf16.shape
    assert np.allclose(np.asarray(out_bf16), ref, atol=3e-2, rtol=3e-2)

    print("KERNEL_OK")
</pallas_src>

<mosaic_0001>
module attributes {stable_mosaic.version = 11 : i64} {
  func.func @_pool_kernel(%arg0: i32, %arg1: memref<8x512xf32, #tpu.memory_space<vmem>>, %arg2: memref<512x336xf32, #tpu.memory_space<vmem>>, %arg3: memref<1x336xf32, #tpu.memory_space<vmem>>, %arg4: memref<8x336xf32, #tpu.memory_space<vmem>>) attributes {dimension_semantics = [#tpu.dimension_semantics<parallel>], iteration_bounds = array<i64: 1>, scalar_prefetch = 0 : i64, scratch_operands = 0 : i64, tpu.core_type = #tpu.core_type<tc>, window_params = [{transform_indices = @transform_0, window_bounds = array<i64: 8, 512>}, {pipeline_mode = #tpu.pipeline_mode<synchronous>, transform_indices = @transform_1, window_bounds = array<i64: 512, 336>}, {pipeline_mode = #tpu.pipeline_mode<synchronous>, transform_indices = @transform_2, window_bounds = array<i64: 1, 336>}, {transform_indices = @transform_3, window_bounds = array<i64: 8, 336>}]} {
    %c0 = arith.constant 0 : index
    %c0_0 = arith.constant 0 : index
    %0 = vector.load %arg1[%c0, %c0_0] : memref<8x512xf32, #tpu.memory_space<vmem>>, vector<8x512xf32>
    %c0_1 = arith.constant 0 : index
    %c0_2 = arith.constant 0 : index
    %1 = vector.load %arg2[%c0_1, %c0_2] : memref<512x336xf32, #tpu.memory_space<vmem>>, vector<512x336xf32>
    %cst = arith.constant dense<0.000000e+00> : vector<8x336xf32>
    %2 = tpu.matmul %0, %1, %cst {dimension_numbers = #tpu.dot_dimension_numbers<[1], [0], [0], [1], [0, 0, 1, 1], [], []>} : vector<8x512xf32>, vector<512x336xf32>, vector<8x336xf32> -> vector<8x336xf32>
    %c0_3 = arith.constant 0 : index
    %c0_4 = arith.constant 0 : index
    %3 = vector.load %arg3[%c0_3, %c0_4] : memref<1x336xf32, #tpu.memory_space<vmem>>, vector<1x336xf32>
    %4 = vector.broadcast %3 : vector<1x336xf32> to vector<8x336xf32>
    %5 = arith.mulf %2, %4 : vector<8x336xf32>
    %c0_5 = arith.constant 0 : index
    %c0_6 = arith.constant 0 : index
    %6 = vector.load %arg4[%c0_5, %c0_6] : memref<8x336xf32, #tpu.memory_space<vmem>>, vector<8x336xf32>
    tpu.vector_store %arg4[%c0_5, %c0_6], %5 {strides = array<i32>} : memref<8x336xf32, #tpu.memory_space<vmem>>, vector<8x336xf32>,
    return
  }
  func.func @transform_0(%arg0: i32) -> (i32, i32) {
    %c0_i32 = arith.constant 0 : i32
    %c0_i32_0 = arith.constant 0 : i32
    return %arg0, %c0_i32 : i32, i32
  }
  func.func @transform_1(%arg0: i32) -> (i32, i32) {
    %c0_i32 = arith.constant 0 : i32
    %c0_i32_0 = arith.constant 0 : i32
    %c0_i32_1 = arith.constant 0 : i32
    return %c0_i32, %c0_i32_0 : i32, i32
  }
  func.func @transform_2(%arg0: i32) -> (i32, i32) {
    %c0_i32 = arith.constant 0 : i32
    %c0_i32_0 = arith.constant 0 : i32
    %c0_i32_1 = arith.constant 0 : i32
    return %c0_i32, %c0_i32_0 : i32, i32
  }
  func.func @transform_3(%arg0: i32) -> (i32, i32) {
    %c0_i32 = arith.constant 0 : i32
    %c0_i32_0 = arith.constant 0 : i32
    return %arg0, %c0_i32 : i32, i32
  }
}

</mosaic_0001>

<bundles_post_ra>
// kernel: adaptive_avg_pool1d.1
= control target key start
LH: loop header
LB: loop body
LE: loop exit
PB: predicated region body
PF: predicated region fallthrough
CT: control target
= control target key end

     0   :  { %8 = vsyncpa [#allocation3], 0  ;;  %s515_s15 = smov [#allocation2]   ;;  %s516_s17 = smov 384   ;;  %s585_s0 = inlined_call_operand.vmem [shape: f32[8,512], index: 0, kind: input, shape index: {}]   ;;  %s586_s1 = inlined_call_operand.hbm [shape: f32[512,336], index: 1, kind: input, shape index: {}]   ;;  %s587_s2 = inlined_call_operand.vmem [shape: f32[1,336], index: 2, kind: input, shape index: {}]   ;;  %s588_s3 = inlined_call_operand.vmem [shape: f32[8,336], index: 3, kind: output, shape index: {}]  }
   0x1   :  { %s15_s14 = sshll.u32 %s586_s1, 4  ;;  %s17_s16 = sshll.u32 %s515_s15, 4  ;;  %s16_s14 = int_to_ptr.hbm [resolvable:$true] %s15_s14  ;;  %s18_s16 = int_to_ptr.vmem [resolvable:$true] %s17_s16 }
   0x2   :  { %s517_s18 = smov 24  }
   0x3   :  { %23 = dma.hbm_to_vmem [thread:$0]  %s16_s14, 24576, %s18_s16, [#allocation3], %s516_s17, %s516_s17, %s517_s18  }
   0x4   :  { %513 = dma.done.wait [#allocation3], 24576  }
   0x5   :  { %514 = vsyncadd [#allocation3], 4294942720  ;;  %v175_v0 = vld [vmem:[#allocation2 + $0x468] sm:$0xff]  ;;  %v172_v1 = vld [vmem:[#allocation2 + $0x450] sm:$0xff]  ;;  %vm479_vm0 = vcmask 654336  }
   0x6   :  { %v223_v2 = vld [vmem:[#allocation2 + $0x5e8] sm:$0xff]  ;;  %266 = vmatpush.msra.mxu2 %v175_v0  ;;  %v169_v5 = vld [vmem:[#allocation2 + $0x438] sm:$0xff]  ;;  %v220_v6 = vld [vmem:[#allocation2 + $0x5d0] sm:$0xff] }
   0x7   :  { %286 = vmatpush.msra.mxu3 %v223_v2  ;;  %v79_v3 = vld [vmem:[#allocation2 + $0x168] sm:$0xff]  ;;  %v76_v7 = vld [vmem:[#allocation2 + $0x150] sm:$0xff]  ;;  %v217_v9 = vld [vmem:[#allocation2 + $0x5b8] sm:$0xff] }
   0x8   :  { %v127_v4 = vld [vmem:[#allocation2 + $0x2e8] sm:$0xff]  ;;  %226 = vmatpush.msra.mxu0 %v79_v3  ;;  %v124_v8 = vld [vmem:[#allocation2 + $0x2d0] sm:$0xff]  ;;  %267 = vmatpush.msra.mxu2 %v172_v1  ;;  %v73_v10 = vld [vmem:[#allocation2 + $0x138] sm:$0xff] }
   0x9   :  { %246 = vmatpush.msra.mxu1 %v127_v4  ;;  %287 = vmatpush.msra.mxu3 %v220_v6  ;;  %v166_v11 = vld [vmem:[#allocation2 + $0x420] sm:$0xff]  ;;  %v121_v12 = vld [vmem:[#allocation2 + $0x2b8] sm:$0xff]  ;;  %v163_v16 = vld [vmem:[#allocation2 + $0x408] sm:$0xff] }
   0xa   :  { %227 = vmatpush.msra.mxu0 %v76_v7  ;;  %v214_v13 = vld [vmem:[#allocation2 + $0x5a0] sm:$0xff]  ;;  %268 = vmatpush.msra.mxu2 %v169_v5  ;;  %v211_v17 = vld [vmem:[#allocation2 + $0x588] sm:$0xff]  ;;  %v160_v20 = vld [vmem:[#allocation2 + $0x3f0] sm:$0xff] }
   0xb   :  { %247 = vmatpush.msra.mxu1 %v124_v8  ;;  %288 = vmatpush.msra.mxu3 %v217_v9  ;;  %v70_v14 = vld [vmem:[#allocation2 + $0x120] sm:$0xff]  ;;  %v67_v18 = vld [vmem:[#allocation2 + $0x108] sm:$0xff]  ;;  %v208_v21 = vld [vmem:[#allocation2 + $0x570] sm:$0xff] }
   0xc   :  { %v118_v15 = vld [vmem:[#allocation2 + $0x2a0] sm:$0xff]  ;;  %228 = vmatpush.msra.mxu0 %v73_v10  ;;  %269 = vmatpush.msra.mxu2 %v166_v11  ;;  %v115_v19 = vld [vmem:[#allocation2 + $0x288] sm:$0xff]  ;;  %v64_v22 = vld [vmem:[#allocation2 + $0xf0] sm:$0xff] }
   0xd   :  { %248 = vmatpush.msra.mxu1 %v121_v12  ;;  %289 = vmatpush.msra.mxu3 %v214_v13  ;;  %v112_v23 = vld [vmem:[#allocation2 + $0x270] sm:$0xff]  ;;  %v157_v24 = vld [vmem:[#allocation2 + $0x3d8] sm:$0xff]  ;;  %v154_v28 = vld [vmem:[#allocation2 + $0x3c0] sm:$0xff] }
   0xe   :  { %229 = vmatpush.msra.mxu0 %v70_v14  ;;  %270 = vmatpush.msra.mxu2 %v163_v16  ;;  %v205_v25 = vld [vmem:[#allocation2 + $0x558] sm:$0xff]  ;;  %v202_v29 = vld [vmem:[#allocation2 + $0x540] sm:$0xff]  ;;  %v151_v32 = vld [vmem:[#allocation2 + $0x3a8] sm:$0xff] }
   0xf   :  { %249 = vmatpush.msra.mxu1 %v118_v15  ;;  %290 = vmatpush.msra.mxu3 %v211_v17  ;;  %v61_v26 = vld [vmem:[#allocation2 + $0xd8] sm:$0xff]  ;;  %v58_v30 = vld [vmem:[#allocation2 + $0xc0] sm:$0xff]  ;;  %v199_v33 = vld [vmem:[#allocation2 + $0x528] sm:$0xff] }
  0x10   :  { %230 = vmatpush.msra.mxu0 %v67_v18  ;;  %271 = vmatpush.msra.mxu2 %v160_v20  ;;  %v109_v27 = vld [vmem:[#allocation2 + $0x258] sm:$0xff]  ;;  %v106_v31 = vld [vmem:[#allocation2 + $0x240] sm:$0xff]  ;;  %v55_v34 = vld [vmem:[#allocation2 + $0xa8] sm:$0xff] }
  0x11   :  { %250 = vmatpush.msra.mxu1 %v115_v19  ;;  %291 = vmatpush.msra.mxu3 %v208_v21  ;;  %v103_v35 = vld [vmem:[#allocation2 + $0x228] sm:$0xff]  ;;  %v148_v36 = vld [vmem:[#allocation2 + $0x390] sm:$0xff]  ;;  %v145_v40 = vld [vmem:[#allocation2 + $0x378] sm:$0xff] }
  0x12   :  { %231 = vmatpush.msra.mxu0 %v64_v22  ;;  %272 = vmatpush.msra.mxu2 %v157_v24  ;;  %v196_v37 = vld [vmem:[#allocation2 + $0x510] sm:$0xff]  ;;  %v193_v41 = vld [vmem:[#allocation2 + $0x4f8] sm:$0xff]  ;;  %v142_v44 = vld [vmem:[#allocation2 + $0x360] sm:$0xff] }
  0x13   :  { %251 = vmatpush.msra.mxu1 %v112_v23  ;;  %292 = vmatpush.msra.mxu3 %v205_v25  ;;  %v52_v38 = vld [vmem:[#allocation2 + $0x90] sm:$0xff]  ;;  %v49_v42 = vld [vmem:[#allocation2 + $0x78] sm:$0xff]  ;;  %v190_v45 = vld [vmem:[#allocation2 + $0x4e0] sm:$0xff] }
  0x14   :  { %232 = vmatpush.msra.mxu0 %v61_v26  ;;  %273 = vmatpush.msra.mxu2 %v154_v28  ;;  %v100_v39 = vld [vmem:[#allocation2 + $0x210] sm:$0xff]  ;;  %v97_v43 = vld [vmem:[#allocation2 + $0x1f8] sm:$0xff]  ;;  %v46_v46 = vld [vmem:[#allocation2 + $0x60] sm:$0xff] }
  0x15   :  { %252 = vmatpush.msra.mxu1 %v109_v27  ;;  %293 = vmatpush.msra.mxu3 %v202_v29  ;;  %v94_v47 = vld [vmem:[#allocation2 + $0x1e0] sm:$0xff]  ;;  %v139_v48 = vld [vmem:[#allocation2 + $0x348] sm:$0xff]  ;;  %v136_v52 = vld [vmem:[#allocation2 + $0x330] sm:$0xff] }
  0x16   :  { %233 = vmatpush.msra.mxu0 %v58_v30  ;;  %274 = vmatpush.msra.mxu2 %v151_v32  ;;  %v187_v49 = vld [vmem:[#allocation2 + $0x4c8] sm:$0xff]  ;;  %v184_v53 = vld [vmem:[#allocation2 + $0x4b0] sm:$0xff]  ;;  %v133_v56 = vld [vmem:[#allocation2 + $0x318] sm:$0xff] }
  0x17   :  { %253 = vmatpush.msra.mxu1 %v106_v31  ;;  %294 = vmatpush.msra.mxu3 %v199_v33  ;;  %v43_v50 = vld [vmem:[#allocation2 + $0x48] sm:$0xff]  ;;  %v40_v54 = vld [vmem:[#allocation2 + $0x30] sm:$0xff]  ;;  %v181_v57 = vld [vmem:[#allocation2 + $0x498] sm:$0xff] }
  0x18   :  { %234 = vmatpush.msra.mxu0 %v55_v34  ;;  %275 = vmatpush.msra.mxu2 %v148_v36  ;;  %v91_v51 = vld [vmem:[#allocation2 + $0x1c8] sm:$0xff]  ;;  %v88_v55 = vld [vmem:[#allocation2 + $0x1b0] sm:$0xff]  ;;  %v37_v58 = vld [vmem:[#allocation2 + $0x18] sm:$0xff] }
  0x19   :  { %254 = vmatpush.msra.mxu1 %v103_v35  ;;  %295 = vmatpush.msra.mxu3 %v196_v37  ;;  %v85_v59 = vld [vmem:[#allocation2 + $0x198] sm:$0xff]  ;;  %v130_v60 = vld [vmem:[#allocation2 + $0x300] sm:$0xff]  ;;  %v176_v62 = vld [vmem:[#allocation2 + $0x470] sm:$0xff] }
  0x1a   :  { %235 = vmatpush.msra.mxu0 %v52_v38  ;;  %276 = vmatpush.msra.mxu2 %v145_v40  ;;  %v178_v61 = vld [vmem:[#allocation2 + $0x480] sm:$0xff]  ;;  %v224_v63 = vld [vmem:[#allocation2 + $0x5f0] sm:$0xff]  ;;  %v173_v2 = vld [vmem:[#allocation2 + $0x458] sm:$0xff] }
  0x1b   :  { %255 = vmatpush.msra.mxu1 %v100_v39  ;;  %296 = vmatpush.msra.mxu3 %v193_v41  ;;  %v34_v0 = vld [vmem:[#allocation2] sm:$0xff]  ;;  %v80_v3 = vld [vmem:[#allocation2 + $0x170] sm:$0xff]  ;;  %v221_v5 = vld [vmem:[#allocation2 + $0x5d8] sm:$0xff] }
  0x1c   :  { %236 = vmatpush.msra.mxu0 %v49_v42  ;;  %277 = vmatpush.msra.mxu2 %v142_v44  ;;  %v82_v1 = vld [vmem:[#allocation2 + $0x180] sm:$0xff]  ;;  %v128_v4 = vld [vmem:[#allocation2 + $0x2f0] sm:$0xff]  ;;  %v77_v7 = vld [vmem:[#allocation2 + $0x158] sm:$0xff] }
  0x1d   :  { %256 = vmatpush.msra.mxu1 %v97_v43  ;;  %297 = vmatpush.msra.mxu3 %v190_v45  ;;  %v170_v6 = vld [vmem:[#allocation2 + $0x440] sm:$0xff]  ;;  %v125_v8 = vld [vmem:[#allocation2 + $0x2d8] sm:$0xff]  ;;  %v167_v10 = vld [vmem:[#allocation2 + $0x428] sm:$0xff] }
  0x1e   :  { %237 = vmatpush.msra.mxu0 %v46_v46  ;;  %278 = vmatpush.msra.mxu2 %v139_v48  ;;  %v218_v9 = vld [vmem:[#allocation2 + $0x5c0] sm:$0xff]  ;;  %v215_v13 = vld [vmem:[#allocation2 + $0x5a8] sm:$0xff]  ;;  %v164_v14 = vld [vmem:[#allocation2 + $0x410] sm:$0xff] }
  0x1f   :  { %257 = vmatpush.msra.mxu1 %v94_v47  ;;  %298 = vmatpush.msra.mxu3 %v187_v49  ;;  %v74_v11 = vld [vmem:[#allocation2 + $0x140] sm:$0xff]  ;;  %v71_v15 = vld [vmem:[#allocation2 + $0x128] sm:$0xff]  ;;  %v212_v17 = vld [vmem:[#allocation2 + $0x590] sm:$0xff] }
  0x20   :  { %238 = vmatpush.msra.mxu0 %v43_v50  ;;  %279 = vmatpush.msra.mxu2 %v136_v52  ;;  %v122_v12 = vld [vmem:[#allocation2 + $0x2c0] sm:$0xff]  ;;  %v119_v16 = vld [vmem:[#allocation2 + $0x2a8] sm:$0xff]  ;;  %v161_v18 = vld [vmem:[#allocation2 + $0x3f8] sm:$0xff] }
  0x21   :  { %258 = vmatpush.msra.mxu1 %v91_v51  ;;  %299 = vmatpush.msra.mxu3 %v184_v53  ;;  %v68_v19 = vld [vmem:[#allocation2 + $0x110] sm:$0xff]  ;;  %v209_v21 = vld [vmem:[#allocation2 + $0x578] sm:$0xff]  ;;  %v158_v22 = vld [vmem:[#allocation2 + $0x3e0] sm:$0xff] }
  0x22   :  { %239 = vmatpush.msra.mxu0 %v40_v54  ;;  %280 = vmatpush.msra.mxu2 %v133_v56  ;;  %v116_v20 = vld [vmem:[#allocation2 + $0x290] sm:$0xff]  ;;  %v65_v23 = vld [vmem:[#allocation2 + $0xf8] sm:$0xff]  ;;  %v206_v25 = vld [vmem:[#allocation2 + $0x560] sm:$0xff] }
  0x23   :  { %259 = vmatpush.msra.mxu1 %v88_v55  ;;  %300 = vmatpush.msra.mxu3 %v181_v57  ;;  %v113_v24 = vld [vmem:[#allocation2 + $0x278] sm:$0xff]  ;;  %v155_v26 = vld [vmem:[#allocation2 + $0x3c8] sm:$0xff]  ;;  %v62_v27 = vld [vmem:[#allocation2 + $0xe0] sm:$0xff] }
  0x24   :  { %240 = vmatpush.msra.mxu0 %v37_v58  ;;  %281 = vmatpush.msra.mxu2 %v130_v60  ;;  %v110_v28 = vld [vmem:[#allocation2 + $0x260] sm:$0xff]  ;;  %v203_v29 = vld [vmem:[#allocation2 + $0x548] sm:$0xff]  ;;  %v152_v30 = vld [vmem:[#allocation2 + $0x3b0] sm:$0xff] }
  0x25   :  { %260 = vmatpush.msra.mxu1 %v85_v59  ;;  %301 = vmatpush.msra.mxu3 %v178_v61  ;;  %v59_v31 = vld [vmem:[#allocation2 + $0xc8] sm:$0xff]  ;;  %v200_v33 = vld [vmem:[#allocation2 + $0x530] sm:$0xff]  ;;  %v149_v34 = vld [vmem:[#allocation2 + $0x398] sm:$0xff] }
  0x26   :  { %346 = vmatpush.msrb.mxu2 %v176_v62  ;;  %241 = vmatpush.msra.mxu0 %v34_v0  ;;  %v107_v32 = vld [vmem:[#allocation2 + $0x248] sm:$0xff]  ;;  %v56_v35 = vld [vmem:[#allocation2 + $0xb0] sm:$0xff]  ;;  %v197_v37 = vld [vmem:[#allocation2 + $0x518] sm:$0xff] }
  0x27   :  { %366 = vmatpush.msrb.mxu3 %v224_v63  ;;  %261 = vmatpush.msra.mxu1 %v82_v1  ;;  %v104_v36 = vld [vmem:[#allocation2 + $0x230] sm:$0xff]  ;;  %v146_v38 = vld [vmem:[#allocation2 + $0x380] sm:$0xff]  ;;  %v53_v39 = vld [vmem:[#allocation2 + $0x98] sm:$0xff] }
  0x28   :  { %347 = vmatpush.msrb.mxu2 %v173_v2  ;;  %306 = vmatpush.msrb.mxu0 %v80_v3  ;;  %v101_v40 = vld [vmem:[#allocation2 + $0x218] sm:$0xff]  ;;  %v194_v41 = vld [vmem:[#allocation2 + $0x500] sm:$0xff]  ;;  %v143_v42 = vld [vmem:[#allocation2 + $0x368] sm:$0xff] }
  0x29   :  { %326 = vmatpush.msrb.mxu1 %v128_v4  ;;  %367 = vmatpush.msrb.mxu3 %v221_v5  ;;  %v50_v43 = vld [vmem:[#allocation2 + $0x80] sm:$0xff]  ;;  %v191_v45 = vld [vmem:[#allocation2 + $0x4e8] sm:$0xff]  ;;  %v140_v46 = vld [vmem:[#allocation2 + $0x350] sm:$0xff] }
  0x2a   :  { %348 = vmatpush.msrb.mxu2 %v170_v6  ;;  %307 = vmatpush.msrb.mxu0 %v77_v7  ;;  %v98_v44 = vld [vmem:[#allocation2 + $0x200] sm:$0xff]  ;;  %v47_v47 = vld [vmem:[#allocation2 + $0x68] sm:$0xff]  ;;  %v188_v49 = vld [vmem:[#allocation2 + $0x4d0] sm:$0xff] }
  0x2b   :  { %327 = vmatpush.msrb.mxu1 %v125_v8  ;;  %368 = vmatpush.msrb.mxu3 %v218_v9  ;;  %v95_v48 = vld [vmem:[#allocation2 + $0x1e8] sm:$0xff]  ;;  %v137_v50 = vld [vmem:[#allocation2 + $0x338] sm:$0xff]  ;;  %v44_v51 = vld [vmem:[#allocation2 + $0x50] sm:$0xff] }
  0x2c   :  { %349 = vmatpush.msrb.mxu2 %v167_v10  ;;  %308 = vmatpush.msrb.mxu0 %v74_v11  ;;  %v92_v52 = vld [vmem:[#allocation2 + $0x1d0] sm:$0xff]  ;;  %v185_v53 = vld [vmem:[#allocation2 + $0x4b8] sm:$0xff]  ;;  %v134_v54 = vld [vmem:[#allocation2 + $0x320] sm:$0xff] }
  0x2d   :  { %328 = vmatpush.msrb.mxu1 %v122_v12  ;;  %369 = vmatpush.msrb.mxu3 %v215_v13  ;;  %v41_v55 = vld [vmem:[#allocation2 + $0x38] sm:$0xff]  ;;  %v182_v57 = vld [vmem:[#allocation2 + $0x4a0] sm:$0xff]  ;;  %v131_v58 = vld [vmem:[#allocation2 + $0x308] sm:$0xff] }
  0x2e   :  { %350 = vmatpush.msrb.mxu2 %v164_v14  ;;  %309 = vmatpush.msrb.mxu0 %v71_v15  ;;  %v89_v56 = vld [vmem:[#allocation2 + $0x1b8] sm:$0xff]  ;;  %v38_v59 = vld [vmem:[#allocation2 + $0x20] sm:$0xff]  ;;  %v544_v60 = vld [vmem:[%s585_s0 + $0x10] sm:$0xff] }
  0x2f   :  { %329 = vmatpush.msrb.mxu1 %v119_v16  ;;  %370 = vmatpush.msrb.mxu3 %v212_v17  ;;  %v86_v61 = vld [vmem:[#allocation2 + $0x1a0] sm:$0xff]  ;;  %v177_v62 = vld [vmem:[#allocation2 + $0x478] sm:$0xff]  ;;  %v179_v63 = vld [vmem:[#allocation2 + $0x488] sm:$0xff] }
  0x30   :  { %351 = vmatpush.msrb.mxu2 %v161_v18  ;;  %310 = vmatpush.msrb.mxu0 %v68_v19  ;;  %v549_v0 = vld [vmem:[%s585_s0 + $0x18] sm:$0xff]  ;;  %v35_v1 = vld [vmem:[#allocation2 + $0x8] sm:$0xff]  ;;  %v174_v2 = vld [vmem:[#allocation2 + $0x460] sm:$0xff] }
  0x31   :  { %330 = vmatpush.msrb.mxu1 %v116_v20  ;;  %371 = vmatpush.msrb.mxu3 %v209_v21  ;;  %v225_v3 = vld [vmem:[#allocation2 + $0x5f8] sm:$0xff]  ;;  %v83_v4 = vld [vmem:[#allocation2 + $0x188] sm:$0xff]  ;;  %v555_v5 = vld [vmem:[%s585_s0] sm:$0xff] }
  0x32   :  { %352 = vmatpush.msrb.mxu2 %v158_v22  ;;  %311 = vmatpush.msrb.mxu0 %v65_v23  ;;  %v561_v6 = vld [vmem:[%s585_s0 + $0x8] sm:$0xff]  ;;  %v81_v7 = vld [vmem:[#allocation2 + $0x178] sm:$0xff]  ;;  %v222_v10 = vld [vmem:[#allocation2 + $0x5e0] sm:$0xff] }
  0x33   :  { %331 = vmatpush.msrb.mxu1 %v113_v24  ;;  %372 = vmatpush.msrb.mxu3 %v206_v25  ;;  %v129_v8 = vld [vmem:[#allocation2 + $0x2f8] sm:$0xff]  ;;  %v171_v9 = vld [vmem:[#allocation2 + $0x448] sm:$0xff]  ;;  %v78_v11 = vld [vmem:[#allocation2 + $0x160] sm:$0xff] }
  0x34   :  { %353 = vmatpush.msrb.mxu2 %v155_v26  ;;  %312 = vmatpush.msrb.mxu0 %v62_v27  ;;  %v126_v12 = vld [vmem:[#allocation2 + $0x2e0] sm:$0xff]  ;;  %v168_v13 = vld [vmem:[#allocation2 + $0x430] sm:$0xff]  ;;  %v219_v14 = vld [vmem:[#allocation2 + $0x5c8] sm:$0xff] }
  0x35   :  { %332 = vmatpush.msrb.mxu1 %v110_v28  ;;  %373 = vmatpush.msrb.mxu3 %v203_v29  ;;  %v75_v15 = vld [vmem:[#allocation2 + $0x148] sm:$0xff]  ;;  %v165_v17 = vld [vmem:[#allocation2 + $0x418] sm:$0xff]  ;;  %v216_v18 = vld [vmem:[#allocation2 + $0x5b0] sm:$0xff] }
  0x36   :  { %354 = vmatpush.msrb.mxu2 %v152_v30  ;;  %313 = vmatpush.msrb.mxu0 %v59_v31  ;;  %v123_v16 = vld [vmem:[#allocation2 + $0x2c8] sm:$0xff]  ;;  %v72_v19 = vld [vmem:[#allocation2 + $0x130] sm:$0xff]  ;;  %v162_v21 = vld [vmem:[#allocation2 + $0x400] sm:$0xff] }
  0x37   :  { %333 = vmatpush.msrb.mxu1 %v107_v32  ;;  %374 = vmatpush.msrb.mxu3 %v200_v33  ;;  %v120_v20 = vld [vmem:[#allocation2 + $0x2b0] sm:$0xff]  ;;  %v213_v22 = vld [vmem:[#allocation2 + $0x598] sm:$0xff]  ;;  %v159_v25 = vld [vmem:[#allocation2 + $0x3e8] sm:$0xff] }
  0x38   :  { %355 = vmatpush.msrb.mxu2 %v149_v34  ;;  %314 = vmatpush.msrb.mxu0 %v56_v35  ;;  %v69_v23 = vld [vmem:[#allocation2 + $0x118] sm:$0xff]  ;;  %v210_v26 = vld [vmem:[#allocation2 + $0x580] sm:$0xff]  ;;  %v156_v29 = vld [vmem:[#allocation2 + $0x3d0] sm:$0xff] }
  0x39   :  { %334 = vmatpush.msrb.mxu1 %v104_v36  ;;  %375 = vmatpush.msrb.mxu3 %v197_v37  ;;  %v117_v24 = vld [vmem:[#allocation2 + $0x298] sm:$0xff]  ;;  %v66_v27 = vld [vmem:[#allocation2 + $0x100] sm:$0xff]  ;;  %v207_v30 = vld [vmem:[#allocation2 + $0x568] sm:$0xff] }
  0x3a   :  { %356 = vmatpush.msrb.mxu2 %v146_v38  ;;  %315 = vmatpush.msrb.mxu0 %v53_v39  ;;  %v114_v28 = vld [vmem:[#allocation2 + $0x280] sm:$0xff]  ;;  %v63_v31 = vld [vmem:[#allocation2 + $0xe8] sm:$0xff]  ;;  %v153_v33 = vld [vmem:[#allocation2 + $0x3b8] sm:$0xff] }
  0x3b   :  { %335 = vmatpush.msrb.mxu1 %v101_v40  ;;  %376 = vmatpush.msrb.mxu3 %v194_v41  ;;  %v111_v32 = vld [vmem:[#allocation2 + $0x268] sm:$0xff]  ;;  %v204_v34 = vld [vmem:[#allocation2 + $0x550] sm:$0xff]  ;;  %v150_v37 = vld [vmem:[#allocation2 + $0x3a0] sm:$0xff] }
  0x3c   :  { %357 = vmatpush.msrb.mxu2 %v143_v42  ;;  %316 = vmatpush.msrb.mxu0 %v50_v43  ;;  %v60_v35 = vld [vmem:[#allocation2 + $0xd0] sm:$0xff]  ;;  %v201_v38 = vld [vmem:[#allocation2 + $0x538] sm:$0xff]  ;;  %v147_v41 = vld [vmem:[#allocation2 + $0x388] sm:$0xff] }
  0x3d   :  { %336 = vmatpush.msrb.mxu1 %v98_v44  ;;  %377 = vmatpush.msrb.mxu3 %v191_v45  ;;  %v108_v36 = vld [vmem:[#allocation2 + $0x250] sm:$0xff]  ;;  %v57_v39 = vld [vmem:[#allocation2 + $0xb8] sm:$0xff]  ;;  %v198_v42 = vld [vmem:[#allocation2 + $0x520] sm:$0xff] }
  0x3e   :  { %358 = vmatpush.msrb.mxu2 %v140_v46  ;;  %317 = vmatpush.msrb.mxu0 %v47_v47  ;;  %v105_v40 = vld [vmem:[#allocation2 + $0x238] sm:$0xff]  ;;  %v54_v43 = vld [vmem:[#allocation2 + $0xa0] sm:$0xff]  ;;  %v144_v45 = vld [vmem:[#allocation2 + $0x370] sm:$0xff] }
  0x3f   :  { %337 = vmatpush.msrb.mxu1 %v95_v48  ;;  %378 = vmatpush.msrb.mxu3 %v188_v49  ;;  %v102_v44 = vld [vmem:[#allocation2 + $0x220] sm:$0xff]  ;;  %v195_v46 = vld [vmem:[#allocation2 + $0x508] sm:$0xff]  ;;  %v141_v49 = vld [vmem:[#allocation2 + $0x358] sm:$0xff] }
  0x40   :  { %359 = vmatpush.msrb.mxu2 %v137_v50  ;;  %318 = vmatpush.msrb.mxu0 %v44_v51  ;;  %v51_v47 = vld [vmem:[#allocation2 + $0x88] sm:$0xff]  ;;  %v192_v50 = vld [vmem:[#allocation2 + $0x4f0] sm:$0xff] }
  0x41   :  { %338 = vmatpush.msrb.mxu1 %v92_v52  ;;  %379 = vmatpush.msrb.mxu3 %v185_v53  ;;  %v99_v48 = vld [vmem:[#allocation2 + $0x208] sm:$0xff]  ;;  %v48_v51 = vld [vmem:[#allocation2 + $0x70] sm:$0xff]  ;;  %v138_v53 = vld [vmem:[#allocation2 + $0x340] sm:$0xff] }
  0x42   :  { %360 = vmatpush.msrb.mxu2 %v134_v54  ;;  %319 = vmatpush.msrb.mxu0 %v41_v55  ;;  %v96_v52 = vld [vmem:[#allocation2 + $0x1f0] sm:$0xff]  ;;  %v189_v54 = vld [vmem:[#allocation2 + $0x4d8] sm:$0xff] }
  0x43   :  { %339 = vmatpush.msrb.mxu1 %v89_v56  ;;  %380 = vmatpush.msrb.mxu3 %v182_v57  ;;  %v45_v55 = vld [vmem:[#allocation2 + $0x58] sm:$0xff]  ;;  %v135_v57 = vld [vmem:[#allocation2 + $0x328] sm:$0xff] }
  0x44   :  { %361 = vmatpush.msrb.mxu2 %v131_v58  ;;  %320 = vmatpush.msrb.mxu0 %v38_v59  ;;  %v93_v56 = vld [vmem:[#allocation2 + $0x1d8] sm:$0xff]  ;;  %v186_v58 = vld [vmem:[#allocation2 + $0x4c0] sm:$0xff] }
  0x45   :  { %282 = vmatmul.f32.vlgmr.msra.gmra.mxu2 %v544_v60  ;;  %340 = vmatpush.msrb.mxu1 %v86_v61  ;;  %v42_v59 = vld [vmem:[#allocation2 + $0x40] sm:$0xff] }
  0x46   :  { %426 = vmatpush.msra.mxu2 %v177_v62  ;;  %381 = vmatpush.msrb.mxu3 %v179_v63  ;;  %v90_v61 = vld [vmem:[#allocation2 + $0x1c0] sm:$0xff]  ;;  %v132_v62 = vld [vmem:[#allocation2 + $0x310] sm:$0xff]  ;;  %v183_v63 = vld [vmem:[#allocation2 + $0x4a8] sm:$0xff] }
  0x47   :  { %302 = vmatmul.f32.vlgmr.msra.gmra.mxu3 %v549_v0  ;;  %321 = vmatpush.msrb.mxu0 %v35_v1  ;;  %v39_v1 = vld [vmem:[#allocation2 + $0x28] sm:$0xff] }
  0x48   :  { %427 = vmatpush.msra.mxu2 %v174_v2  ;;  %446 = vmatpush.msra.mxu3 %v225_v3  ;;  %v87_v2 = vld [vmem:[#allocation2 + $0x1a8] sm:$0xff]  ;;  %v180_v3 = vld [vmem:[#allocation2 + $0x490] sm:$0xff] }
  0x49   :  { %341 = vmatpush.msrb.mxu1 %v83_v4  ;;  %242 = vmatmul.f32.vlgmr.msra.gmra.mxu0 %v555_v5  ;;  %v36_v4 = vld [vmem:[#allocation2 + $0x10] sm:$0xff] }
  0x4a   :  { %262 = vmatmul.f32.vlgmr.msra.gmra.mxu1 %v561_v6  ;;  %386 = vmatpush.msra.mxu0 %v81_v7  ;;  %v84_v7 = vld [vmem:[#allocation2 + $0x190] sm:$0xff] }
  0x4b   :  { %406 = vmatpush.msra.mxu1 %v129_v8  ;;  %428 = vmatpush.msra.mxu2 %v171_v9 }
  0x4c   :  { %447 = vmatpush.msra.mxu3 %v222_v10  ;;  %387 = vmatpush.msra.mxu0 %v78_v11  ;;  %v466_v10 = vld [vmem:[%s587_s2] sm:$0x7] }
  0x4d   :  { %407 = vmatpush.msra.mxu1 %v126_v12  ;;  %429 = vmatpush.msra.mxu2 %v168_v13 }
  0x4e   :  { %448 = vmatpush.msra.mxu3 %v219_v14  ;;  %388 = vmatpush.msra.mxu0 %v75_v15  ;;  %v468_v14 = vperm.slane %v466_v10, 0 }
  0x4f   :  { %408 = vmatpush.msra.mxu1 %v123_v16  ;;  %430 = vmatpush.msra.mxu2 %v165_v17 }
  0x50   :  { %449 = vmatpush.msra.mxu3 %v216_v18  ;;  %389 = vmatpush.msra.mxu0 %v72_v19 }
  0x51   :  { %409 = vmatpush.msra.mxu1 %v120_v20  ;;  %431 = vmatpush.msra.mxu2 %v162_v21  ;;  %v469_v20 = vperm.slane %v466_v10, 1 }
  0x52   :  { %450 = vmatpush.msra.mxu3 %v213_v22  ;;  %390 = vmatpush.msra.mxu0 %v69_v23 }
  0x53   :  { %410 = vmatpush.msra.mxu1 %v117_v24  ;;  %432 = vmatpush.msra.mxu2 %v159_v25 }
  0x54   :  { %451 = vmatpush.msra.mxu3 %v210_v26  ;;  %391 = vmatpush.msra.mxu0 %v66_v27 }
  0x55   :  { %411 = vmatpush.msra.mxu1 %v114_v28  ;;  %433 = vmatpush.msra.mxu2 %v156_v29  ;;  %v470_v28 = vperm.slane %v466_v10, 2 }
  0x56   :  { %452 = vmatpush.msra.mxu3 %v207_v30  ;;  %392 = vmatpush.msra.mxu0 %v63_v31 }
  0x57   :  { %412 = vmatpush.msra.mxu1 %v111_v32  ;;  %434 = vmatpush.msra.mxu2 %v153_v33 }
  0x58   :  { %453 = vmatpush.msra.mxu3 %v204_v34  ;;  %393 = vmatpush.msra.mxu0 %v60_v35 }
  0x59   :  { %413 = vmatpush.msra.mxu1 %v108_v36  ;;  %435 = vmatpush.msra.mxu2 %v150_v37 }
  0x5a   :  { %454 = vmatpush.msra.mxu3 %v201_v38  ;;  %394 = vmatpush.msra.mxu0 %v57_v39 }
  0x5b   :  { %414 = vmatpush.msra.mxu1 %v105_v40  ;;  %436 = vmatpush.msra.mxu2 %v147_v41 }
  0x5c   :  { %455 = vmatpush.msra.mxu3 %v198_v42  ;;  %395 = vmatpush.msra.mxu0 %v54_v43 }
  0x5d   :  { %415 = vmatpush.msra.mxu1 %v102_v44  ;;  %437 = vmatpush.msra.mxu2 %v144_v45 }
  0x5e   :  { %456 = vmatpush.msra.mxu3 %v195_v46  ;;  %362 = vmatmul.f32.vlgmr.msrb.gmra.mxu2 %v544_v60 }
  0x5f   :  { %396 = vmatpush.msra.mxu0 %v51_v47  ;;  %416 = vmatpush.msra.mxu1 %v99_v48 }
  0x60   :  { %438 = vmatpush.msra.mxu2 %v141_v49  ;;  %457 = vmatpush.msra.mxu3 %v192_v50 }
  0x61   :  { %382 = vmatmul.f32.vlgmr.msrb.gmra.mxu3 %v549_v0  ;;  %397 = vmatpush.msra.mxu0 %v48_v51 }
  0x62   :  { %417 = vmatpush.msra.mxu1 %v96_v52  ;;  %439 = vmatpush.msra.mxu2 %v138_v53 }
  0x63   :  { %458 = vmatpush.msra.mxu3 %v189_v54  ;;  %322 = vmatmul.f32.vlgmr.msrb.gmra.mxu0 %v555_v5 }
  0x64   :  { %342 = vmatmul.f32.vlgmr.msrb.gmra.mxu1 %v561_v6  ;;  %398 = vmatpush.msra.mxu0 %v45_v55 }
  0x65   :  { %418 = vmatpush.msra.mxu1 %v93_v56  ;;  %440 = vmatpush.msra.mxu2 %v135_v57 }
  0x66   :  { %459 = vmatpush.msra.mxu3 %v186_v58  ;;  %399 = vmatpush.msra.mxu0 %v42_v59 }
  0x67   :  { %419 = vmatpush.msra.mxu1 %v90_v61  ;;  %441 = vmatpush.msra.mxu2 %v132_v62 }
  0x68   :  { %460 = vmatpush.msra.mxu3 %v183_v63  ;;  %442 = vmatmul.f32.vlgmr.msra.gmra.mxu2 %v544_v60 }
  0x69   :  { %400 = vmatpush.msra.mxu0 %v39_v1  ;;  %420 = vmatpush.msra.mxu1 %v87_v2 }
  0x6a   :  { %461 = vmatpush.msra.mxu3 %v180_v3 }
  0x6b   :  { %462 = vmatmul.f32.vlgmr.msra.gmra.mxu3 %v549_v0  ;;  %401 = vmatpush.msra.mxu0 %v36_v4 }
  0x6c   :  { %421 = vmatpush.msra.mxu1 %v84_v7  ;;  %402 = vmatmul.f32.vlgmr.msra.gmra.mxu0 %v555_v5 }
  0x6d   :  { %422 = vmatmul.f32.vlgmr.msra.gmra.mxu1 %v561_v6 }
  0xc6   :  { %v243_v8 = vpop.f32.mrf.mxu0 }
  0xc7   :  { %v263_v9 = vpop.f32.mrf.mxu1 }
  0xc8   :  { %v264_v60 = vadd.f32 %v263_v9, %v243_v8  ;;  %v283_v11 = vpop.f32.mrf.mxu2 }
  0xca   :  { %v284_v12 = vadd.f32 %v283_v11, %v264_v60  ;;  %v303_v13 = vpop.f32.mrf.mxu3 }
  0xcc   :  { %v304_v15 = vadd.f32 %v303_v13, %v284_v12 }
  0xce   :  { %v474_v16 = vmul.f32 %v468_v14, %v304_v15 }
  0xd0   :  { %477 = vst [vmem:[%s588_s3] sm:$0xff] %v474_v16 }
  0xe0   :  { %v323_v0 = vpop.f32.mrf.mxu0 }
  0xe1   :  { %v343_v5 = vpop.f32.mrf.mxu1  ;;  %v363_v6 = vpop.f32.mrf.mxu2 }
  0xe2   :  { %v344_v17 = vadd.f32 %v343_v5, %v323_v0 }
  0xe4   :  { %v364_v18 = vadd.f32 %v363_v6, %v344_v17  ;;  %v383_v19 = vpop.f32.mrf.mxu3 }
  0xe6   :  { %v384_v21 = vadd.f32 %v383_v19, %v364_v18 }
  0xe8   :  { %v475_v22 = vmul.f32 %v469_v20, %v384_v21 }
  0xe9   :  { %v403_v23 = vpop.f32.mrf.mxu0 }
  0xea   :  { %478 = vst [vmem:[%s588_s3 + $0x8] sm:$0xff] %v475_v22  ;;  %v423_v24 = vpop.f32.mrf.mxu1 }
  0xeb   :  { %v424_v25 = vadd.f32 %v423_v24, %v403_v23  ;;  %v443_v26 = vpop.f32.mrf.mxu2 }
  0xed   :  { %v444_v27 = vadd.f32 %v443_v26, %v424_v25 }
  0xee   :  { %v463_v29 = vpop.f32.mrf.mxu3 }
  0xef   :  { %v464_v30 = vadd.f32 %v463_v29, %v444_v27 }
  0xf1   :  { %v476_v31 = vmul.f32 %v470_v28, %v464_v30 }
  0xf3   :  { %480 = vst.msk [vmem:[%s588_s3 + $0x10] sm:$0xff] %vm479_vm0, %v476_v31 }
  0xf4   :  { %485 = vsyncpa [#allocation3], 1 }

</bundles_post_ra>
